<compile_context>
chip_gen: v6e
topology: v6e:2x2x1
jax: 0.10.0
libtpu: 0.0.40
codegen_flags: <defaults>
</compile_context>

<pallas_src>
import functools

import jax
import jax.numpy as jnp
from jax import lax
from jax.experimental import pallas as pl
from jax.experimental.pallas import tpu as pltpu


def _pam_kernel(xq_ref, xkv_ref, wq_ref, bq_ref, wk_ref, bk_ref, wv_ref,
                bv_ref, gamma_ref, o_ref, q_scr, m_scr, l_scr, acc_scr,
                *, compute_dtype):
    ki = pl.program_id(2)
    nk = pl.num_programs(2)

    # --- init per query tile: project Q once, reset online-softmax state ---
    @pl.when(ki == 0)
    def _init():
        xq = xq_ref[0].astype(compute_dtype)                        # (C, TQ)
        q_scr[...] = (jnp.dot(wq_ref[...].astype(compute_dtype), xq,
                              preferred_element_type=jnp.float32)
                      + bq_ref[...])                                # (Cq, TQ)
        m_scr[...] = jnp.full_like(m_scr, -jnp.inf)
        l_scr[...] = jnp.zeros_like(l_scr)
        acc_scr[...] = jnp.zeros_like(acc_scr)

    # --- K / V projections for this key tile (1x1 convs as channel matmuls) --
    xkv = xkv_ref[0].astype(compute_dtype)                          # (C, TK)
    k = (jnp.dot(wk_ref[...].astype(compute_dtype), xkv,
                 preferred_element_type=jnp.float32)
         + bk_ref[...])                                             # (Cq, TK)
    v = (jnp.dot(wv_ref[...].astype(compute_dtype), xkv,
                 preferred_element_type=jnp.float32)
         + bv_ref[...])                                             # (C, TK)

    # s[j, i] = <k[:, j], q[:, i]> == energy[i, j]; contraction over Cq,
    # expressed with dot_general so nothing is transposed in-kernel.
    s = lax.dot_general(k.astype(compute_dtype),
                        q_scr[...].astype(compute_dtype),
                        (((0,), (0,)), ((), ())),
                        preferred_element_type=jnp.float32)         # (TK, TQ)

    # --- online softmax over the key axis (axis 0) ---
    m_prev = m_scr[...]                                             # (1, TQ)
    m_new = jnp.maximum(m_prev, jnp.max(s, axis=0, keepdims=True))
    alpha = jnp.exp(m_prev - m_new)                                 # (1, TQ)
    p = jnp.exp(s - m_new)                                          # (TK, TQ)
    l_scr[...] = alpha * l_scr[...] + jnp.sum(p, axis=0, keepdims=True)
    # acc[c, i] += sum_j v[c, j] * p[j, i]  -- contraction dim = TK (big).
    acc_scr[...] = alpha * acc_scr[...] + jnp.dot(
        v.astype(compute_dtype), p.astype(compute_dtype),
        preferred_element_type=jnp.float32)                         # (C, TQ)
    m_scr[...] = m_new

    # --- epilogue: normalize, residual, lane-dense store ---
    @pl.when(ki == nk - 1)
    def _finalize():
        inv_l = pl.reciprocal(l_scr[...], approx=True)              # EUP vrcp
        out = acc_scr[...] * inv_l                                  # (C, TQ)
        x_res = xq_ref[0].astype(jnp.float32)
        o_ref[0] = (gamma_ref[0, 0] * out + x_res).astype(o_ref.dtype)


@functools.partial(jax.jit, static_argnames=("tq", "tk", "use_bf16_matmul"))
def pam_forward(x_nchw, wq, bq, wk, bk, wv, bv, gamma, *, tq=512, tk=512,
                use_bf16_matmul=False):
    """x_nchw: (B, C, H, W).  Returns (B, C, H, W). Matches PAM_Module.forward."""
    B, C, H, W = x_nchw.shape
    N = H * W
    Cq = wq.shape[0]
    tq = min(tq, N)
    tk = min(tk, N)
    if N % tq or N % tk:
        # TODO(synk): pad N to a tile multiple to lift this restriction.
        raise ValueError(f"H*W={N} must be divisible by tq={tq} and tk={tk}")
    nq, nk = N // tq, N // tk

    x_bcn = x_nchw.reshape(B, C, N)          # free reshape; no HBM transpose
    bq2 = bq.reshape(Cq, 1)
    bk2 = bk.reshape(Cq, 1)
    bv2 = bv.reshape(C, 1)
    gamma2 = gamma.reshape(1, 1)

    compute_dtype = jnp.bfloat16 if use_bf16_matmul else jnp.float32

    def full(*shape):
        return pl.BlockSpec(shape, lambda b, qi, ki: tuple(0 for _ in shape))

    flops = 2 * B * (N * Cq * C            # Q projection (once per query tile)
                     + nq * N * Cq * C     # K projection (recomputed per q-tile)
                     + nq * N * C * C      # V projection (recomputed per q-tile)
                     + N * N * Cq          # Q K^T
                     + N * N * C)          # attn @ V
    cost = pl.CostEstimate(
        flops=int(flops),
        transcendentals=int(B * N * N),
        bytes_accessed=int(4 * B * N * C * (2 + nq)),
    )

    out_bcn = pl.pallas_call(
        functools.partial(_pam_kernel, compute_dtype=compute_dtype),
        out_shape=jax.ShapeDtypeStruct((B, C, N), x_nchw.dtype),
        grid_spec=pltpu.PrefetchScalarGridSpec(
            num_scalar_prefetch=0,
            grid=(B, nq, nk),
            in_specs=[
                pl.BlockSpec((1, C, tq), lambda b, qi, ki: (b, 0, qi)),  # x (q tile)
                pl.BlockSpec((1, C, tk), lambda b, qi, ki: (b, 0, ki)),  # x (kv tile)
                full(Cq, C),                                             # Wq
                full(Cq, 1),                                             # bq
                full(Cq, C),                                             # Wk
                full(Cq, 1),                                             # bk
                full(C, C),                                              # Wv
                full(C, 1),                                              # bv
                pl.BlockSpec(memory_space=pltpu.MemorySpace.SMEM),       # gamma
            ],
            out_specs=pl.BlockSpec((1, C, tq), lambda b, qi, ki: (b, 0, qi)),
            scratch_shapes=[
                pltpu.VMEM((Cq, tq), jnp.float32),   # cached Q tile
                pltpu.VMEM((1, tq), jnp.float32),    # running max m
                pltpu.VMEM((1, tq), jnp.float32),    # running sum l
                pltpu.VMEM((C, tq), jnp.float32),    # output accumulator
            ],
        ),
        compiler_params=pltpu.CompilerParams(
            dimension_semantics=("parallel", "parallel", "arbitrary"),
            vmem_limit_bytes=32 * 1024 * 1024,
        ),
        cost_estimate=cost,
    )(x_bcn, x_bcn, wq, bq2, wk, bk2, wv, bv2, gamma2)

    return out_bcn.reshape(B, C, H, W)


def pam_reference(x_nchw, wq, bq, wk, bk, wv, bv, gamma):
    """Pure-JAX reference mirroring the PyTorch forward semantics."""
    B, C, H, W = x_nchw.shape
    N = H * W
    x = x_nchw.reshape(B, C, N)
    q = jnp.einsum('oc,bcn->bon', wq, x) + bq[None, :, None]       # (B, Cq, N)
    k = jnp.einsum('oc,bcn->bon', wk, x) + bk[None, :, None]       # (B, Cq, N)
    v = jnp.einsum('oc,bcn->bon', wv, x) + bv[None, :, None]       # (B, C, N)
    energy = jnp.einsum('boi,boj->bij', q, k)                      # (B, N, N)
    attn = jax.nn.softmax(energy, axis=-1)
    out = jnp.einsum('bcj,bij->bci', v, attn)                      # (B, C, N)
    out = gamma.reshape(()) * out + x
    return out.reshape(B, C, H, W)


if __name__ == "__main__":
    # Small shapes consistent with the module (in_dim >= 8 so in_dim // 8 >= 1).
    B, C, H, W = 2, 32, 16, 16
    Cq = C // 8

    key = jax.random.PRNGKey(0)
    kx, kwq, kbq, kwk, kbk, kwv, kbv = jax.random.split(key, 7)

    x = jax.random.normal(kx, (B, C, H, W), dtype=jnp.float32)

    # Deterministic parameter init (shapes from the 1x1 Conv2d layers).
    scale = 1.0 / jnp.sqrt(jnp.float32(C))
    wq = jax.random.uniform(kwq, (Cq, C), jnp.float32, -scale, scale)
    bq = jax.random.uniform(kbq, (Cq,), jnp.float32, -scale, scale)
    wk = jax.random.uniform(kwk, (Cq, C), jnp.float32, -scale, scale)
    bk = jax.random.uniform(kbk, (Cq,), jnp.float32, -scale, scale)
    wv = jax.random.uniform(kwv, (C, C), jnp.float32, -scale, scale)
    bv = jax.random.uniform(kbv, (C,), jnp.float32, -scale, scale)

    for g in (0.0, 0.5):
        gamma = jnp.full((1,), g, dtype=jnp.float32)
        ref = pam_reference(x, wq, bq, wk, bk, wv, bv, gamma)

        # f32 matmul path; tiles chosen so the grid has multiple query AND key
        # steps (exercises the online-softmax accumulation).  Tolerance covers
        # the approximate (EUP) reciprocal used for the softmax denominator.
        out = pam_forward(x, wq, bq, wk, bk, wv, bv, gamma, tq=128, tk=128)
        out = jax.block_until_ready(out)
        assert out.shape == (B, C, H, W)
        err = jnp.max(jnp.abs(out - ref))
        assert jnp.allclose(out, ref, atol=5e-3, rtol=5e-3), (
            f"f32 mismatch at gamma={g}: max err {err}")

        # bf16 matmul path (MXU-native on v6e/v7x); looser tolerance.
        out_bf16 = pam_forward(x, wq, bq, wk, bk, wv, bv, gamma,
                               tq=128, tk=256, use_bf16_matmul=True)
        out_bf16 = jax.block_until_ready(out_bf16)
        err_bf16 = jnp.max(jnp.abs(out_bf16 - ref))
        assert jnp.allclose(out_bf16, ref, atol=5e-2, rtol=5e-2), (
            f"bf16 mismatch at gamma={g}: max err {err_bf16}")

    print("KERNEL_OK")
</pallas_src>

<mosaic_0001>
module attributes {stable_mosaic.version = 11 : i64} {
  func.func @_pam_kernel(%arg0: i32, %arg1: i32, %arg2: i32, %arg3: memref<1x32x128xf32, #tpu.memory_space<vmem>>, %arg4: memref<1x32x128xf32, #tpu.memory_space<vmem>>, %arg5: memref<4x32xf32, #tpu.memory_space<vmem>>, %arg6: memref<4x1xf32, #tpu.memory_space<vmem>>, %arg7: memref<4x32xf32, #tpu.memory_space<vmem>>, %arg8: memref<4x1xf32, #tpu.memory_space<vmem>>, %arg9: memref<32x32xf32, #tpu.memory_space<vmem>>, %arg10: memref<32x1xf32, #tpu.memory_space<vmem>>, %arg11: memref<1x1xf32, #tpu.memory_space<smem>>, %arg12: memref<1x32x128xf32, #tpu.memory_space<vmem>>, %arg13: memref<4x128xf32, #tpu.memory_space<vmem>>, %arg14: memref<1x128xf32, #tpu.memory_space<vmem>>, %arg15: memref<1x128xf32, #tpu.memory_space<vmem>>, %arg16: memref<32x128xf32, #tpu.memory_space<vmem>>) attributes {dimension_semantics = [#tpu.dimension_semantics<parallel>, #tpu.dimension_semantics<parallel>, #tpu.dimension_semantics<arbitrary>], iteration_bounds = array<i64: 2, 2, 2>, scalar_prefetch = 0 : i64, scratch_operands = 4 : i64, tpu.core_type = #tpu.core_type<tc>, window_params = [{transform_indices = @transform_0, window_bounds = array<i64: 1, 32, 128>}, {transform_indices = @transform_1, window_bounds = array<i64: 1, 32, 128>}, {pipeline_mode = #tpu.pipeline_mode<synchronous>, transform_indices = @transform_2, window_bounds = array<i64: 4, 32>}, {pipeline_mode = #tpu.pipeline_mode<synchronous>, transform_indices = @transform_3, window_bounds = array<i64: 4, 1>}, {pipeline_mode = #tpu.pipeline_mode<synchronous>, transform_indices = @transform_4, window_bounds = array<i64: 4, 32>}, {pipeline_mode = #tpu.pipeline_mode<synchronous>, transform_indices = @transform_5, window_bounds = array<i64: 4, 1>}, {pipeline_mode = #tpu.pipeline_mode<synchronous>, transform_indices = @transform_6, window_bounds = array<i64: 32, 32>}, {pipeline_mode = #tpu.pipeline_mode<synchronous>, transform_indices = @transform_7, window_bounds = array<i64: 32, 1>}, {transform_indices = @transform_8, window_bounds = array<i64: 1, 1>}, {transform_indices = @transform_9, window_bounds = array<i64: 1, 32, 128>}]} {
    %c0_i32 = arith.constant 0 : i32
    %0 = arith.cmpi eq, %arg2, %c0_i32 : i32
    %1 = arith.extui %0 : i1 to i32
    %c0_i32_0 = arith.constant 0 : i32
    %2 = arith.cmpi ne, %1, %c0_i32_0 : i32
    scf.if %2 {
      %c0_31 = arith.constant 0 : index
      %c0_32 = arith.constant 0 : index
      %c0_33 = arith.constant 0 : index
      %42 = vector.load %arg3[%c0_31, %c0_32, %c0_33] : memref<1x32x128xf32, #tpu.memory_space<vmem>>, vector<1x32x128xf32>
      %43 = vector.shape_cast %42 : vector<1x32x128xf32> to vector<32x128xf32>
      %c0_34 = arith.constant 0 : index
      %c0_35 = arith.constant 0 : index
      %44 = vector.load %arg5[%c0_34, %c0_35] : memref<4x32xf32, #tpu.memory_space<vmem>>, vector<4x32xf32>
      %cst_36 = arith.constant dense<0.000000e+00> : vector<4x128xf32>
      %45 = tpu.matmul %44, %43, %cst_36 {dimension_numbers = #tpu.dot_dimension_numbers<[1], [0], [0], [1], [0, 0, 1, 1], [], []>} : vector<4x32xf32>, vector<32x128xf32>, vector<4x128xf32> -> vector<4x128xf32>
      %c0_37 = arith.constant 0 : index
      %c0_38 = arith.constant 0 : index
      %46 = vector.load %arg6[%c0_37, %c0_38] : memref<4x1xf32, #tpu.memory_space<vmem>>, vector<4x1xf32>
      %47 = vector.broadcast %46 : vector<4x1xf32> to vector<4x128xf32>
      %48 = arith.addf %45, %47 : vector<4x128xf32>
      %c0_39 = arith.constant 0 : index
      %c0_40 = arith.constant 0 : index
      %49 = vector.load %arg13[%c0_39, %c0_40] : memref<4x128xf32, #tpu.memory_space<vmem>>, vector<4x128xf32>
      tpu.vector_store %arg13[%c0_39, %c0_40], %48 {strides = array<i32>} : memref<4x128xf32, #tpu.memory_space<vmem>>, vector<4x128xf32>,
      %cst_41 = arith.constant 0xFF800000 : f32
      %50 = vector.broadcast %cst_41 : f32 to vector<1x128xf32>
      %c0_42 = arith.constant 0 : index
      %c0_43 = arith.constant 0 : index
      %51 = vector.load %arg14[%c0_42, %c0_43] : memref<1x128xf32, #tpu.memory_space<vmem>>, vector<1x128xf32>
      tpu.vector_store %arg14[%c0_42, %c0_43], %50 {strides = array<i32>} : memref<1x128xf32, #tpu.memory_space<vmem>>, vector<1x128xf32>,
      %cst_44 = arith.constant 0.000000e+00 : f32
      %52 = vector.broadcast %cst_44 : f32 to vector<1x128xf32>
      %c0_45 = arith.constant 0 : index
      %c0_46 = arith.constant 0 : index
      %53 = vector.load %arg15[%c0_45, %c0_46] : memref<1x128xf32, #tpu.memory_space<vmem>>, vector<1x128xf32>
      tpu.vector_store %arg15[%c0_45, %c0_46], %52 {strides = array<i32>} : memref<1x128xf32, #tpu.memory_space<vmem>>, vector<1x128xf32>,
      %cst_47 = arith.constant 0.000000e+00 : f32
      %54 = vector.broadcast %cst_47 : f32 to vector<32x128xf32>
      %c0_48 = arith.constant 0 : index
      %c0_49 = arith.constant 0 : index
      %55 = vector.load %arg16[%c0_48, %c0_49] : memref<32x128xf32, #tpu.memory_space<vmem>>, vector<32x128xf32>
      tpu.vector_store %arg16[%c0_48, %c0_49], %54 {strides = array<i32>} : memref<32x128xf32, #tpu.memory_space<vmem>>, vector<32x128xf32>,
    } else {
    }
    %c0 = arith.constant 0 : index
    %c0_1 = arith.constant 0 : index
    %c0_2 = arith.constant 0 : index
    %3 = vector.load %arg4[%c0, %c0_1, %c0_2] : memref<1x32x128xf32, #tpu.memory_space<vmem>>, vector<1x32x128xf32>
    %4 = vector.shape_cast %3 : vector<1x32x128xf32> to vector<32x128xf32>
    %c0_3 = arith.constant 0 : index
    %c0_4 = arith.constant 0 : index
    %5 = vector.load %arg7[%c0_3, %c0_4] : memref<4x32xf32, #tpu.memory_space<vmem>>, vector<4x32xf32>
    %cst = arith.constant dense<0.000000e+00> : vector<4x128xf32>
    %6 = tpu.matmul %5, %4, %cst {dimension_numbers = #tpu.dot_dimension_numbers<[1], [0], [0], [1], [0, 0, 1, 1], [], []>} : vector<4x32xf32>, vector<32x128xf32>, vector<4x128xf32> -> vector<4x128xf32>
    %c0_5 = arith.constant 0 : index
    %c0_6 = arith.constant 0 : index
    %7 = vector.load %arg8[%c0_5, %c0_6] : memref<4x1xf32, #tpu.memory_space<vmem>>, vector<4x1xf32>
    %8 = vector.broadcast %7 : vector<4x1xf32> to vector<4x128xf32>
    %9 = arith.addf %6, %8 : vector<4x128xf32>
    %c0_7 = arith.constant 0 : index
    %c0_8 = arith.constant 0 : index
    %10 = vector.load %arg9[%c0_7, %c0_8] : memref<32x32xf32, #tpu.memory_space<vmem>>, vector<32x32xf32>
    %cst_9 = arith.constant dense<0.000000e+00> : vector<32x128xf32>
    %11 = tpu.matmul %10, %4, %cst_9 {dimension_numbers = #tpu.dot_dimension_numbers<[1], [0], [0], [1], [0, 0, 1, 1], [], []>} : vector<32x32xf32>, vector<32x128xf32>, vector<32x128xf32> -> vector<32x128xf32>
    %c0_10 = arith.constant 0 : index
    %c0_11 = arith.constant 0 : index
    %12 = vector.load %arg10[%c0_10, %c0_11] : memref<32x1xf32, #tpu.memory_space<vmem>>, vector<32x1xf32>
    %13 = vector.broadcast %12 : vector<32x1xf32> to vector<32x128xf32>
    %14 = arith.addf %11, %13 : vector<32x128xf32>
    %c0_12 = arith.constant 0 : index
    %c0_13 = arith.constant 0 : index
    %15 = vector.load %arg13[%c0_12, %c0_13] : memref<4x128xf32, #tpu.memory_space<vmem>>, vector<4x128xf32>
    %cst_14 = arith.constant dense<0.000000e+00> : vector<128x128xf32>
    %16 = tpu.matmul %9, %15, %cst_14 {dimension_numbers = #tpu.dot_dimension_numbers<[0], [0], [1], [1], [0, 1, 1, 1], [], []>} : vector<4x128xf32>, vector<4x128xf32>, vector<128x128xf32> -> vector<128x128xf32>
    %c0_15 = arith.constant 0 : index
    %c0_16 = arith.constant 0 : index
    %17 = vector.load %arg14[%c0_15, %c0_16] : memref<1x128xf32, #tpu.memory_space<vmem>>, vector<1x128xf32>
    %cst_17 = arith.constant dense<0xFF800000> : vector<128xf32>
    %18 = vector.multi_reduction <maximumf>, %16, %cst_17 [0] : vector<128x128xf32> to vector<128xf32>
    %19 = vector.shape_cast %18 : vector<128xf32> to vector<1x128xf32>
    %20 = arith.maximumf %17, %19 : vector<1x128xf32>
    %21 = arith.subf %17, %20 : vector<1x128xf32>
    %22 = math.exp %21 : vector<1x128xf32>
    %23 = vector.broadcast %20 : vector<1x128xf32> to vector<128x128xf32>
    %24 = arith.subf %16, %23 : vector<128x128xf32>
    %25 = math.exp %24 : vector<128x128xf32>
    %c0_18 = arith.constant 0 : index
    %c0_19 = arith.constant 0 : index
    %26 = vector.load %arg15[%c0_18, %c0_19] : memref<1x128xf32, #tpu.memory_space<vmem>>, vector<1x128xf32>
    %27 = arith.mulf %22, %26 : vector<1x128xf32>
    %cst_20 = arith.constant dense<0.000000e+00> : vector<128xf32>
    %28 = vector.multi_reduction <add>, %25, %cst_20 [0] : vector<128x128xf32> to vector<128xf32>
    %29 = vector.shape_cast %28 : vector<128xf32> to vector<1x128xf32>
    %30 = arith.addf %27, %29 : vector<1x128xf32>
    %c0_21 = arith.constant 0 : index
    %c0_22 = arith.constant 0 : index
    %31 = vector.load %arg15[%c0_21, %c0_22] : memref<1x128xf32, #tpu.memory_space<vmem>>, vector<1x128xf32>
    tpu.vector_store %arg15[%c0_21, %c0_22], %30 {strides = array<i32>} : memref<1x128xf32, #tpu.memory_space<vmem>>, vector<1x128xf32>,
    %c0_23 = arith.constant 0 : index
    %c0_24 = arith.constant 0 : index
    %32 = vector.load %arg16[%c0_23, %c0_24] : memref<32x128xf32, #tpu.memory_space<vmem>>, vector<32x128xf32>
    %33 = vector.broadcast %22 : vector<1x128xf32> to vector<32x128xf32>
    %34 = arith.mulf %33, %32 : vector<32x128xf32>
    %cst_25 = arith.constant dense<0.000000e+00> : vector<32x128xf32>
    %35 = tpu.matmul %14, %25, %cst_25 {dimension_numbers = #tpu.dot_dimension_numbers<[1], [0], [0], [1], [0, 0, 1, 1], [], []>} : vector<32x128xf32>, vector<128x128xf32>, vector<32x128xf32> -> vector<32x128xf32>
    %36 = arith.addf %34, %35 : vector<32x128xf32>
    %c0_26 = arith.constant 0 : index
    %c0_27 = arith.constant 0 : index
    %37 = vector.load %arg16[%c0_26, %c0_27] : memref<32x128xf32, #tpu.memory_space<vmem>>, vector<32x128xf32>
    tpu.vector_store %arg16[%c0_26, %c0_27], %36 {strides = array<i32>} : memref<32x128xf32, #tpu.memory_space<vmem>>, vector<32x128xf32>,
    %c0_28 = arith.constant 0 : index
    %c0_29 = arith.constant 0 : index
    %38 = vector.load %arg14[%c0_28, %c0_29] : memref<1x128xf32, #tpu.memory_space<vmem>>, vector<1x128xf32>
    tpu.vector_store %arg14[%c0_28, %c0_29], %20 {strides = array<i32>} : memref<1x128xf32, #tpu.memory_space<vmem>>, vector<1x128xf32>,
    %c1_i32 = arith.constant 1 : i32
    %39 = arith.cmpi eq, %arg2, %c1_i32 : i32
    %40 = arith.extui %39 : i1 to i32
    %c0_i32_30 = arith.constant 0 : i32
    %41 = arith.cmpi ne, %40, %c0_i32_30 : i32
    scf.if %41 {
      %c0_31 = arith.constant 0 : index
      %c0_32 = arith.constant 0 : index
      %42 = vector.load %arg15[%c0_31, %c0_32] : memref<1x128xf32, #tpu.memory_space<vmem>>, vector<1x128xf32>
      %43 = tpu.reciprocal %42 {approx = true} : vector<1x128xf32> -> vector<1x128xf32>
      %c0_33 = arith.constant 0 : index
      %c0_34 = arith.constant 0 : index
      %44 = vector.load %arg16[%c0_33, %c0_34] : memref<32x128xf32, #tpu.memory_space<vmem>>, vector<32x128xf32>
      %45 = vector.broadcast %43 : vector<1x128xf32> to vector<32x128xf32>
      %46 = arith.mulf %44, %45 : vector<32x128xf32>
      %c0_35 = arith.constant 0 : index
      %c0_36 = arith.constant 0 : index
      %c0_37 = arith.constant 0 : index
      %47 = vector.load %arg3[%c0_35, %c0_36, %c0_37] : memref<1x32x128xf32, #tpu.memory_space<vmem>>, vector<1x32x128xf32>
      %48 = vector.shape_cast %47 : vector<1x32x128xf32> to vector<32x128xf32>
      %c0_38 = arith.constant 0 : index
      %c0_39 = arith.constant 0 : index
      %49 = memref.load %arg11[%c0_38, %c0_39] : memref<1x1xf32, #tpu.memory_space<smem>>
      %50 = vector.broadcast %49 : f32 to vector<32x128xf32>
      %51 = arith.mulf %50, %46 : vector<32x128xf32>
      %52 = arith.addf %51, %48 : vector<32x128xf32>
      %c0_40 = arith.constant 0 : index
      %c0_41 = arith.constant 0 : index
      %c0_42 = arith.constant 0 : index
      %53 = vector.load %arg12[%c0_40, %c0_41, %c0_42] : memref<1x32x128xf32, #tpu.memory_space<vmem>>, vector<1x32x128xf32>
      %54 = vector.shape_cast %53 : vector<1x32x128xf32> to vector<32x128xf32>
      %55 = vector.shape_cast %52 : vector<32x128xf32> to vector<1x32x128xf32>
      tpu.vector_store %arg12[%c0_40, %c0_41, %c0_42], %55 {strides = array<i32>} : memref<1x32x128xf32, #tpu.memory_space<vmem>>, vector<1x32x128xf32>,
    } else {
    }
    return
  }
  func.func @transform_0(%arg0: i32, %arg1: i32, %arg2: i32) -> (i32, i32, i32) {
    %c0_i32 = arith.constant 0 : i32
    %c0_i32_0 = arith.constant 0 : i32
    return %arg0, %c0_i32, %arg1 : i32, i32, i32
  }
  func.func @transform_1(%arg0: i32, %arg1: i32, %arg2: i32) -> (i32, i32, i32) {
    %c0_i32 = arith.constant 0 : i32
    %c0_i32_0 = arith.constant 0 : i32
    return %arg0, %c0_i32, %arg2 : i32, i32, i32
  }
  func.func @transform_2(%arg0: i32, %arg1: i32, %arg2: i32) -> (i32, i32) {
    %c0_i32 = arith.constant 0 : i32
    %c0_i32_0 = arith.constant 0 : i32
    %c0_i32_1 = arith.constant 0 : i32
    return %c0_i32, %c0_i32_0 : i32, i32
  }
  func.func @transform_3(%arg0: i32, %arg1: i32, %arg2: i32) -> (i32, i32) {
    %c0_i32 = arith.constant 0 : i32
    %c0_i32_0 = arith.constant 0 : i32
    %c0_i32_1 = arith.constant 0 : i32
    return %c0_i32, %c0_i32_0 : i32, i32
  }
  func.func @transform_4(%arg0: i32, %arg1: i32, %arg2: i32) -> (i32, i32) {
    %c0_i32 = arith.constant 0 : i32
    %c0_i32_0 = arith.constant 0 : i32
    %c0_i32_1 = arith.constant 0 : i32
    return %c0_i32, %c0_i32_0 : i32, i32
  }
  func.func @transform_5(%arg0: i32, %arg1: i32, %arg2: i32) -> (i32, i32) {
    %c0_i32 = arith.constant 0 : i32
    %c0_i32_0 = arith.constant 0 : i32
    %c0_i32_1 = arith.constant 0 : i32
    return %c0_i32, %c0_i32_0 : i32, i32
  }
  func.func @transform_6(%arg0: i32, %arg1: i32, %arg2: i32) -> (i32, i32) {
    %c0_i32 = arith.constant 0 : i32
    %c0_i32_0 = arith.constant 0 : i32
    %c0_i32_1 = arith.constant 0 : i32
    return %c0_i32, %c0_i32_0 : i32, i32
  }
  func.func @transform_7(%arg0: i32, %arg1: i32, %arg2: i32) -> (i32, i32) {
    %c0_i32 = arith.constant 0 : i32
    %c0_i32_0 = arith.constant 0 : i32
    %c0_i32_1 = arith.constant 0 : i32
    return %c0_i32, %c0_i32_0 : i32, i32
  }
  func.func @transform_8(%arg0: i32, %arg1: i32, %arg2: i32) -> (i32, i32) {
    %c0_i32 = arith.constant 0 : i32
    %c0_i32_0 = arith.constant 0 : i32
    %c0_i32_1 = arith.constant 0 : i32
    return %c0_i32, %c0_i32_0 : i32, i32
  }
  func.func @transform_9(%arg0: i32, %arg1: i32, %arg2: i32) -> (i32, i32, i32) {
    %c0_i32 = arith.constant 0 : i32
    %c0_i32_0 = arith.constant 0 : i32
    return %arg0, %c0_i32, %arg1 : i32, i32, i32
  }
}

</mosaic_0001>

<bundles_post_ra>
// kernel: pam_forward.1
= control target key start
LH: loop header
LB: loop body
LE: loop exit
PB: predicated region body
PF: predicated region fallthrough
CT: control target
= control target key end

     0   :  { %s2214_s0 = inlined_call_operand.vmem [shape: f32[2,32,256], index: 0, kind: input, shape index: {}, may-alias: {0,1}]   ;;  %s2215_s1 = inlined_call_operand.vmem [shape: f32[2,32,256], index: 1, kind: input, shape index: {}, may-alias: {0,1}]   ;;  %s2216_s2 = inlined_call_operand.vmem [shape: f32[4,32], index: 2, kind: input, shape index: {}]   ;;  %s2217_s3 = inlined_call_operand.vmem [shape: f32[4,1], index: 3, kind: input, shape index: {}]   ;;  %s2218_s4 = inlined_call_operand.vmem [shape: f32[4,32], index: 4, kind: input, shape index: {}]   ;;  %s2219_s5 = inlined_call_operand.vmem [shape: f32[4,1], index: 5, kind: input, shape index: {}]   ;;  %s2220_s6 = inlined_call_operand.vmem [shape: f32[32,32], index: 6, kind: input, shape index: {}]   ;;  %s2221_s7 = inlined_call_operand.vmem [shape: f32[32,1], index: 7, kind: input, shape index: {}]   ;;  %s2222_s8 = inlined_call_operand.<no memory space> [shape: f32[1,1], index: 8, kind: input, shape index: {}]   ;;  %s2223_s9 = inlined_call_operand.vmem [shape: f32[2,32,256], index: 9, kind: output, shape index: {}]  }
   0x1   :  { %2228 = sst [smem:[#allocation16_spill]] %s2223_s9 }
   0x2   :  { %14 = sst [smem:[#allocation6]] %s2222_s8 }
   0x3   :  { %s1894_s11 = smov 0   ;;  %s1896_s12 = smov 0  }
   0x4   :  { %s1898_s13 = smov 0   ;;  %s1900_s14 = smov 0  }
   0x5   :  { %s1902_s15 = smov 0   ;;  %s1904_s16 = smov 0  }
   0x6   :  { %s1906_s17 = smov 0   ;;  %s1908_s18 = smov 0  }
   0x7   :  { %s1910_s19 = smov 0   ;;  %s1912_s20 = smov 0  }
   0x8   :  { %s1914_s8 = smov 0  }
   0x9 LB: > { %2229 = sst [smem:[#allocation10_spill]] %s1812_s16  ;;  %s32_s21 = sadd.s32 1, %s1820_s18  ;;  %s1832_s8 = sphi %s1914_s8, %s20_s8   ;;  %s1828_s20 = sphi %s1912_s20, %s2254_s20   ;;  %s1824_s19 = sphi %s1910_s19, %s2253_s19   ;;  %s1820_s18 = sphi %s1908_s18, %s2252_s18   ;;  %s1816_s17 = sphi %s1906_s17, %s2251_s17   ;;  %s1812_s16 = sphi %s1904_s16, %s2250_s16   ;;  %s1808_s15 = sphi %s1902_s15, %s2249_s15   ;;  %s1804_s14 = sphi %s1900_s14, %s2248_s14   ;;  %s1800_s13 = sphi %s1898_s13, %s2247_s13   ;;  %s1796_s12 = sphi %s1896_s12, %s2246_s12   ;;  %s1792_s11 = sphi %s1894_s11, %s2245_s11  }
   0xa   : > { %2230 = sst [smem:[#allocation11_spill]] %s1816_s17  ;;  %p33_p0 = scmp.ge.s32.totalorder %s32_s21, 2 }
   0xb   : > { %s35_s22 = sadd.s32 1, %s1824_s19  ;;  %p55_p1 = scmp.ne.s32.totalorder %s1804_s14, %s1800_s13 }
   0xc   : > { %s2256_s21 = smov (%p33_p0, %s32_s21), 0  ;;  %s2258_s22 = smov (!%p33_p0, %s35_s22), %s1824_s19 }
   0xd   : > { %2231 = sst [smem:[#allocation12_spill]] %s2256_s21  ;;  %p56_p2 = scmp.eq.s32.totalorder %s1832_s8, 0 }
   0xe   : > { %p37_p3 = scmp.ge.s32.totalorder %s2258_s22, 2  ;;  %s39_s23 = sadd.s32 1, %s1828_s20 }
   0xf   : > { %s1413_s24 = sadd.s32 4294967295, %s1832_s8   ;;  %p1962_p4 = por %p56_p2, %p55_p1 }
  0x10   : > { %s2260_s22 = smov (%p37_p3, %s2258_s22), 0  ;;  %s2262_s23 = smov (!%p37_p3, %s39_s23), %s1828_s20 }
  0x11   : > { %2233 = sst [smem:[#allocation13_spill]] %s2260_s22  ;;  %s72_s26 = ssub.s32 %s1820_s18, %s2256_s21 }
  0x12   : > { %p83_p5 = scmp.ne.s32.totalorder %s1796_s12, %s1792_s11  ;;  %p41_p6 = scmp.ge.s32.totalorder %s2262_s23, 2 }
  0x13   : > { %p262_p7 = scmp.eq.s32.totalorder %s1413_s24, 7  ;;  %s44_s27 = ssub.s32 %s1824_s19, %s2260_s22 }
  0x14   : > { %p1975_p8 = por %p83_p5, %p56_p2  ;;  %s2264_s23 = smov (%p41_p6, %s2262_s23), 0 }
  0x15   : > { %2235 = sst [smem:[#allocation14_spill]] %s2264_s23  ;;  %s48_s29 = sadd.s32 1, %s1804_s14 }
  0x16   : > { %p1985_p9 = por %p262_p7, %p55_p1  ;;  %s43_s10 = ssub.s32 %s1828_s20, %s2264_s23 }
  0x17   : > { %s76_s21 = sadd.s32 1, %s1796_s12  ;;  %s45_s9 = sor.u32 %s44_s27, %s43_s10 }
  0x18   : > { %s2236_s30 = scalar_select %p1985_p9, 1, 0 }
  0x19   : > { %s73_s16 = sor.u32 %s72_s26, %s43_s10  ;;  %p46_p10 = scmp.eq.s32.totalorder %s45_s9, 0 }
  0x1a   : > { %2237 = sst [smem:[#allocation15_spill]] %s2236_s30  ;;  %p74_p11 = scmp.eq.s32.totalorder %s73_s16, 0 }
  0x1b   : > { %s1993_s24 = scalar_select %p46_p10, %s1804_s14, %s48_s29  }
  0x1c   : > { %s1996_s22 = scalar_select %p74_p11, %s1796_s12, %s76_s21  }
  0x1d   : > { %p1416_p12 = scmp.ge.s32.totalorder %s1832_s8, 8 }
  0x1f   : > { %305 = sbr.rel (%p1416_p12) target bundleno = 52 (0x34), region = 44 }
  0x24   : > { %308 = sbr.rel (!%p1962_p4) target bundleno = 44 (0x2c), region = 48  ;;  %s310_s17 = sand.u32 (%p1962_p4), 1, %s1804_s14  }
  0x25   : > { %s1418_s23 = sshll.u32 (%p1962_p4), %s1828_s20, 3  ;;  %s1417_s30 = sshll.u32 (%p1962_p4), %s310_s17, 5 }
  0x26   : > { %s314_s27 = sadd.s32 (%p1962_p4), %s1824_s19, %s1418_s23  ;;  %s312_s21 = scalar_lea.vmem (%p1962_p4), [#allocation7], %s1417_s30 }
  0x27   : > { %s1419_s26 = sshll.u32 (%p1962_p4), %s314_s27, 3 }
  0x28   : > { %s316_s29 = scalar_lea.vmem (%p1962_p4), %s2214_s0, %s1419_s26 }
  0x29   : > { %v351_v0 = vld [vmem:[%s316_s29] sm:$0xff]  ;;  %v353_v1 = vld [vmem:[%s316_s29 + $0x10] sm:$0xff] }
  0x2a   : > { %v355_v2 = vld [vmem:[%s316_s29 + $0x20] sm:$0xff]  ;;  %352 = vst [vmem:[%s312_s21] sm:$0xff] %v351_v0  ;;  %354 = vst [vmem:[%s312_s21 + $0x8] sm:$0xff] %v353_v1  ;;  %v357_v3 = vld [vmem:[%s316_s29 + $0x30] sm:$0xff] }
  0x2b   : > { %356 = vst [vmem:[%s312_s21 + $0x10] sm:$0xff] %v355_v2  ;;  %358 = vst [vmem:[%s312_s21 + $0x18] sm:$0xff] %v357_v3 }
  0x2c PF: > { %364 = sbr.rel (!%p1975_p8) target bundleno = 52 (0x34), region = 86  ;;  %s366_s17 = sand.u32 (%p1975_p8), 1, %s1796_s12  }
  0x2d   : > { %s1421_s23 = sshll.u32 (%p1975_p8), %s1828_s20, 3  ;;  %s1420_s25 = sshll.u32 (%p1975_p8), %s366_s17, 5 }
  0x2e   : > { %s370_s10 = sadd.s32 (%p1975_p8), %s1820_s18, %s1421_s23  ;;  %s368_s16 = scalar_lea.vmem (%p1975_p8), [#allocation8], %s1420_s25 }
  0x2f   : > { %s1422_s27 = sshll.u32 (%p1975_p8), %s370_s10, 3 }
  0x30   : > { %s372_s30 = scalar_lea.vmem (%p1975_p8), %s2215_s1, %s1422_s27 }
  0x31   : > { %v407_v4 = vld [vmem:[%s372_s30] sm:$0xff]  ;;  %v409_v5 = vld [vmem:[%s372_s30 + $0x10] sm:$0xff] }
  0x32   : > { %v411_v6 = vld [vmem:[%s372_s30 + $0x20] sm:$0xff]  ;;  %408 = vst [vmem:[%s368_s16] sm:$0xff] %v407_v4  ;;  %410 = vst [vmem:[%s368_s16 + $0x8] sm:$0xff] %v409_v5  ;;  %v413_v7 = vld [vmem:[%s372_s30 + $0x30] sm:$0xff] }
  0x33   : > { %412 = vst [vmem:[%s368_s16 + $0x10] sm:$0xff] %v411_v6  ;;  %414 = vst [vmem:[%s368_s16 + $0x18] sm:$0xff] %v413_v7 }
  0x34 PF: > { %p1423_p13 = scmp.ge.s32.totalorder %s1832_s8, 1  ;;  %p419_p0 = scmp.lt.s32.totalorder %s1832_s8, 9 }
  0x36   : > { %p420_p1 = pnand %p1423_p13, %p419_p0 }
  0x37   : > { %s426_s28 = sand.u32 (!%p420_p1), 1, %s1800_s13   ;;  %s433_s29 = sand.u32 (!%p420_p1), 1, %s1792_s11  }
  0x38   : > { %423 = sbr.rel (%p420_p1) target bundleno = 1166 (0x48e), region = 124  ;;  %s1424_s21 = sshll.u32 (!%p420_p1), %s426_s28, 5 }
  0x39   : > { %s1425_s17 = sshll.u32 (!%p420_p1), %s433_s29, 5  ;;  %s2019_s23 = scalar_lea.vmem (!%p420_p1), [#allocation7], %s1424_s21 }
  0x3a   : > { %s2021_s25 = scalar_lea.vmem (!%p420_p1), [#allocation8], %s1425_s17  ;;  %s2023_s10 = scalar_lea.vmem (!%p420_p1), [#allocation9], %s1424_s21 }
  0x3b   : > { %p1427_p2 = scmp.ne.s32.totalorder (!%p420_p1), %s1808_s15, 0 }
  0x3d   : > { %474 = sbr.rel (%p1427_p2) target bundleno = 271 (0x10f), region = 136 }
  0x42   : > { %v478_v8 = vld [vmem:[%s2019_s23 + $0x18] sm:$0xff]  ;;  %v1834_v9 = vmov 0.0   ;;  %v477_v10 = vld [vmem:[%s2019_s23 + $0x10] sm:$0xff]  ;;  %vm1835_vm0 = vmmov 0   ;;  %v1836_v12 = vmov 0   ;;  %v476_v13 = vld [vmem:[%s2019_s23 + $0x8] sm:$0xff] }
  0x43   : > { %1512 = vmatprep.subr.mxu0 %v1834_v9  ;;  %562 = vst [vmem:[#allocation4] sm:$0x1] %v1834_v9  ;;  %563 = vst [vmem:[#allocation5 + $0x10] sm:$0xff] %v1834_v9  ;;  %1520 = vmatprep.mubr.msk.f32.mxu0 %vm1835_vm0, %v1834_v9  ;;  %v480_v11 = vld [vmem:[%s2217_s3] sm:$0xf]  ;;  %v475_v14 = vld [vmem:[%s2019_s23] sm:$0xff] }
  0x44   : > { %564 = vst [vmem:[#allocation5] sm:$0xff] %v1834_v9  ;;  %565 = vst [vmem:[#allocation5 + $0x18] sm:$0xff] %v1834_v9  ;;  %1513 = vmatpush3.msra.mxu0 %v478_v8  ;;  %1707 = vset.pattern.permute.xlu0 %v1836_v12  ;;  %v479_v15 = vld [vmem:[%s2216_s2] sm:$0xf]  ;;  %vm486_vm1 = vcmask 261120   ;;  %v1837_v16 = vmov -inf  }
  0x45   : > { %566 = vst [vmem:[#allocation5 + $0x8] sm:$0xff] %v1834_v9  ;;  %1514 = vmatprep.subr.mxu0 %v1834_v9  ;;  %483 = vperm.xlu0 %1707, %v480_v11   ;;  %561 = vst [vmem:[#allocation3] sm:$0x1] %v1837_v16 }
  0x46   : > { %1515 = vmatpush3.msra.mxu0 %v477_v10 }
  0x47   : > { %1516 = vmatprep.subr.mxu0 %v1834_v9 }
  0x48   : > { %1517 = vmatpush3.msra.mxu0 %v476_v13 }
  0x49   : > { %1518 = vmatprep.subr.mxu0 %v1834_v9 }
  0x4a   : > { %1519 = vmatpush3.msra.mxu0 %v475_v14 }
  0x4b   : > { %1521 = vmatmul.mubr.msk.f32.vlgmr.msra.gmra.mxu0 %vm486_vm1, %v479_v15 }
  0xc0   : > { %v484_v17 = vpop.permute.xlu0 %483 }
 0x10b   : > { %v556_v18 = vpop.f32.mrf.mxu0 }
 0x10c   : > { %v557_v19 = vadd.f32 %v556_v18, %v484_v17 }
 0x10d   : > { %v1522_v20 = vpop.f32.mrf.mxu0 }
 0x10e   : > { %560 = vst [vmem:[#allocation2] sm:$0xf] %v557_v19 }
 0x10f PF: > { %v570_v21 = vld [vmem:[%s2021_s25 + $0x18] sm:$0xff]  ;;  %v1838_v22 = vmov 0.0   ;;  %v569_v23 = vld [vmem:[%s2021_s25 + $0x10] sm:$0xff]  ;;  %vm1839_vm2 = vmmov 0   ;;  %v1840_v25 = vmov 0   ;;  %v568_v26 = vld [vmem:[%s2021_s25 + $0x8] sm:$0xff] }
 0x110   : > { %1523 = vmatprep.subr.mxu0 %v1838_v22  ;;  %1531 = vmatprep.mubr.msk.f32.mxu0 %vm1839_vm2, %v1838_v22  ;;  %v572_v24 = vld [vmem:[%s2219_s5] sm:$0xf]  ;;  %v567_v27 = vld [vmem:[%s2021_s25] sm:$0xff]  ;;  %vm578_vm3 = vcmask 261120   ;;  %vm859_vm4 = vcmask 1043456   ;;  %v654_v36 = vld [vmem:[%s2220_s6 + $0x10] sm:$0xff] }
 0x111   : > { %1524 = vmatpush3.msra.mxu0 %v570_v21  ;;  %1708 = vset.pattern.permute.xlu0 %v1840_v25  ;;  %v571_v28 = vld [vmem:[%s2218_s4] sm:$0xf]  ;;  %v653_v35 = vld [vmem:[%s2220_s6 + $0x8] sm:$0xff]  ;;  %v655_v38 = vld [vmem:[%s2220_s6 + $0x18] sm:$0xff]  ;;  %vm810_vm5 = vcmask 31744   ;;  %p1451_p3 = scmp.ne.s32.totalorder %s1808_s15, 1 }
 0x112   : > { %1525 = vmatprep.subr.mxu0 %v1838_v22  ;;  %575 = vperm.xlu0 %1708, %v572_v24   ;;  %v652_v34 = vld [vmem:[%s2220_s6] sm:$0xff]  ;;  %v657_v39 = vld [vmem:[%s2221_s7 + $0x8] sm:$0xff]  ;;  %v658_v40 = vld [vmem:[%s2221_s7 + $0x10] sm:$0xff]  ;;  %s1245_s11 = sld [smem:[#allocation6]] (!%p1451_p3) }
 0x113   : > { %1526 = vmatpush3.msra.mxu0 %v569_v23  ;;  %1534 = vmatprep.subr.mxu1 %v570_v21  ;;  %v656_v37 = vld [vmem:[%s2221_s7] sm:$0xff]  ;;  %v659_v41 = vld [vmem:[%s2221_s7 + $0x18] sm:$0xff] }
 0x114   : > { %1527 = vmatprep.subr.mxu0 %v1838_v22  ;;  %1535 = vmatpush3.msra.mxu1 %v570_v21 }
 0x115   : > { %1528 = vmatpush3.msra.mxu0 %v568_v26  ;;  %1536 = vmatprep.subr.mxu1 %v569_v23  ;;  %v777_v31 = vld [vmem:[#allocation2] sm:$0xf] }
 0x116   : > { %1529 = vmatprep.subr.mxu0 %v1838_v22  ;;  %1537 = vmatpush3.msra.mxu1 %v569_v23 }
 0x117   : > { %1530 = vmatpush3.msra.mxu0 %v567_v27  ;;  %1538 = vmatprep.subr.mxu1 %v568_v26 }
 0x118   : > { %1532 = vmatmul.mubr.msk.f32.vlgmr.msra.gmra.mxu0 %vm578_vm3, %v571_v28  ;;  %1539 = vmatpush3.msra.mxu1 %v568_v26 }
 0x119   : > { %1540 = vmatprep.subr.mxu1 %v567_v27  ;;  %1709 = vset.pattern.permute.xlu1 %v1840_v25 }
 0x11a   : > { %1541 = vmatpush3.msra.mxu1 %v567_v27  ;;  %1548 = vmatprep.subr.msk.mxu0 %vm859_vm4, %v777_v31 }
 0x11b   : > { %1549 = vmatpush3.msk.msra.mxu0 %vm859_vm4, %v777_v31  ;;  %1542 = vmatprep.mubr.msk.f32.mxu1 %vm578_vm3, %v652_v34  ;;  %v1035_v31 = vlaneseq }
 0x11c   : > { %1543 = vmatmul.mubr.msk.f32.vlgmr.msra.gmra.mxu1 %vm578_vm3, %v653_v35  ;;  %662 = vperm.xlu1 %1709, %v656_v37  }
 0x11d   : > { %1545 = vmatprep.mubr.msk.f32.mxu1 %vm578_vm3, %v654_v36  ;;  %v1036_v34 = vshrl.u32 %v1035_v31, 7  ;;  %v1008_v36 = vld [vmem:[#allocation3] sm:$0x1] }
 0x120   : > { %1546 = vmatmul.mubr.msk.f32.gmra.mxu1 %vm578_vm3, %v655_v38  ;;  %667 = vperm.xlu1 %1709, %v657_v39   ;;  %v2117_v38 = vsub.s32 0, %v1036_v34 }
 0x124   : > { %672 = vperm.xlu1 %1709, %v658_v40  }
 0x128   : > { %677 = vperm.xlu1 %1709, %v659_v41  }
 0x18d   : > { %v576_v29 = vpop.permute.xlu0 %575 }
 0x197   : > { %v663_v59 = vpop.permute.xlu1 %662 }
 0x1d8   : > { %v648_v30 = vpop.f32.mrf.mxu0 }
 0x1d9   : > { %v649_v32 = vadd.f32 %v648_v30, %v576_v29 }
 0x1da   : > { %v1533_v33 = vpop.f32.mrf.mxu0 }
 0x1db   : > { %778 = vxpose.xlu0.b32.start.end [1/1] (short) %v649_v32, 128 }
 0x1dc   : > { %v2091_v58 = vpop.f32.mrf.mxu1 }
 0x1de   : > { %v758_v60 = vpop.f32.mrf.mxu1 }
 0x1df   : > { %v759_v61 = vadd.f32 %v758_v60, %v663_v59 }
 0x1e1   : > { %1606 = vmatprep.mubr.f32.mxu1 %v759_v61 }
 0x257   : > { %v794_v42 = vpop.trf.xlu0 }
 0x258   : > { %1550 = vmatprep.mubr.msk.f32.mxu0 %vm810_vm5, %v794_v42 }
 0x25b   : > { %v795_v43 = vpop.trf.xlu0 }
 0x25c   : > { %1551 = vmatmul.mubr.msk.f32.vlgmr.msra.gmra.mxu0 %vm810_vm5, %v795_v43 }
 0x25f   : > { %v796_v44 = vpop.trf.xlu0 }
 0x260   : > { %1553 = vmatprep.mubr.msk.f32.mxu0 %vm810_vm5, %v796_v44 }
 0x263   : > { %v797_v45 = vpop.trf.xlu0 }
 0x264   : > { %1554 = vmatmul.mubr.msk.f32.gmra.mxu0 %vm810_vm5, %v797_v45 }
 0x267   : > { %v798_v46 = vpop.trf.xlu0 }
 0x268   : > { %1556 = vmatprep.mubr.msk.f32.mxu0 %vm810_vm5, %v798_v46 }
 0x26b   : > { %v799_v47 = vpop.trf.xlu0 }
 0x26c   : > { %1557 = vmatmul.mubr.msk.f32.gmra.mxu0 %vm810_vm5, %v799_v47 }
 0x26f   : > { %v800_v48 = vpop.trf.xlu0 }
 0x270   : > { %1559 = vmatprep.mubr.msk.f32.mxu0 %vm810_vm5, %v800_v48 }
 0x273   : > { %v801_v49 = vpop.trf.xlu0 }
 0x274   : > { %1560 = vmatmul.mubr.msk.f32.gmra.mxu0 %vm810_vm5, %v801_v49 }
 0x277   : > { %v802_v50 = vpop.trf.xlu0 }
 0x278   : > { %1562 = vmatprep.mubr.msk.f32.mxu0 %vm810_vm5, %v802_v50 }
 0x27b   : > { %v803_v51 = vpop.trf.xlu0 }
 0x27c   : > { %1563 = vmatmul.mubr.msk.f32.gmra.mxu0 %vm810_vm5, %v803_v51 }
 0x27f   : > { %v804_v52 = vpop.trf.xlu0 }
 0x280   : > { %1565 = vmatprep.mubr.msk.f32.mxu0 %vm810_vm5, %v804_v52 }
 0x283   : > { %v805_v53 = vpop.trf.xlu0 }
 0x284   : > { %1566 = vmatmul.mubr.msk.f32.gmra.mxu0 %vm810_vm5, %v805_v53 }
 0x287   : > { %v806_v54 = vpop.trf.xlu0 }
 0x288   : > { %1568 = vmatprep.mubr.msk.f32.mxu0 %vm810_vm5, %v806_v54 }
 0x28b   : > { %v807_v55 = vpop.trf.xlu0 }
 0x28c   : > { %1569 = vmatmul.mubr.msk.f32.gmra.mxu0 %vm810_vm5, %v807_v55 }
 0x28f   : > { %v808_v56 = vpop.trf.xlu0 }
 0x290   : > { %1571 = vmatprep.mubr.msk.f32.mxu0 %vm810_vm5, %v808_v56 }
 0x293   : > { %v809_v57 = vpop.trf.xlu0 }
 0x294   : > { %1572 = vmatmul.mubr.msk.f32.gmra.mxu0 %vm810_vm5, %v809_v57 }
 0x31c   : > { %v2093_v62 = vpop.f32.mrf.mxu0 }
 0x31e   : > { %v2095_v63 = vpop.f32.mrf.mxu0 }
 0x324   : > { %v2097_v0 = vpop.f32.mrf.mxu0 }
 0x326   : > { %v2099_v1 = vpop.f32.mrf.mxu0 }
 0x32c   : > { %v2101_v2 = vpop.f32.mrf.mxu0 }
 0x32d   : > { %v1010_v13 = vmax.f32 %v2093_v62, %v2101_v2 }
 0x32e   : > { %v2103_v3 = vpop.f32.mrf.mxu0 }
 0x32f   : > { %v1009_v11 = vmax.f32 %v2095_v63, %v2103_v3 }
 0x334   : > { %v2105_v4 = vpop.f32.mrf.mxu0 }
 0x335   : > { %v1012_v14 = vmax.f32 %v2097_v0, %v2105_v4 }
 0x336   : > { %v2107_v5 = vpop.f32.mrf.mxu0 }
 0x337   : > { %v1011_v15 = vmax.f32 %v2099_v1, %v2107_v5 }
 0x33c   : > { %v1564_v6 = vpop.f32.mrf.mxu0 }
 0x33d   : > { %v1014_v18 = vmax.f32 %v1010_v13, %v1564_v6 }
 0x33e   : > { %v969_v7 = vpop.f32.mrf.mxu0 }
 0x33f   : > { %v1013_v16 = vmax.f32 %v1009_v11, %v969_v7 }
 0x344   : > { %v1567_v8 = vpop.f32.mrf.mxu0 }
 0x345   : > { %v1016_v19 = vmax.f32 %v1012_v14, %v1567_v8 }
 0x346   : > { %v979_v9 = vpop.f32.mrf.mxu0 }
 0x347   : > { %v1015_v20 = vmax.f32 %v1011_v15, %v979_v9 }
 0x34c   : > { %v1570_v10 = vpop.f32.mrf.mxu0 }
 0x34d   : > { %v1018_v23 = vmax.f32 %v1014_v18, %v1570_v10 }
 0x34e   : > { %v989_v12 = vpop.f32.mrf.mxu0 }
 0x34f   : > { %v1017_v21 = vmax.f32 %v1013_v16, %v989_v12 }
 0x351   : > { %v1021_v26 = vmax.f32 %v1017_v21, %v1018_v23 }
 0x354   : > { %v1573_v17 = vpop.f32.mrf.mxu0 }
 0x355   : > { %v1020_v24 = vmax.f32 %v1016_v19, %v1573_v17 }
 0x356   : > { %v999_v22 = vpop.f32.mrf.mxu0 }
 0x357   : > { %v1019_v25 = vmax.f32 %v1015_v20, %v999_v22 }
 0x359   : > { %v1022_v27 = vmax.f32 %v1019_v25, %v1020_v24 }
 0x35b   : > { %v1023_v28 = vmax.f32 %v1021_v26, %v1022_v27 }
 0x35d   : > { %v1024_v29 = vrot.slane %v1023_v28, 4 }
 0x35f   : > { %v1025_v30 = vmax.f32 %v1023_v28, %v1024_v29 }
 0x361   : > { %v1026_v32 = vrot.slane %v1025_v30, 2 }
 0x363   : > { %v1027_v33 = vmax.f32 %v1025_v30, %v1026_v32 }
 0x365   : > { %v1028_v35 = vrot.slane %v1027_v33, 1 }
 0x367   : > { %v1029_v37 = vmax.f32 %v1027_v33, %v1028_v35  ;;  %v668_v33 = vpop.permute.xlu1 %667 }
 0x369   : > { %v1030_v39 = vmax.f32 %v1008_v36, %v1029_v37 }
 0x36b   : > { %v1031_v40 = vsub.f32 %v1008_v36, %v1030_v39  ;;  %v1038_v41 = vrot.slane %v1030_v39, %v2117_v38  ;;  %1220 = vst [vmem:[#allocation3] sm:$0x1] %v1030_v39  ;;  %v1547_v36 = vpop.f32.mrf.mxu1  ;;  %v673_v39 = vpop.permute.xlu1 %672 }
 0x36d   : > { %v1032_v42 = vmul.f32 1.442695, %v1031_v40  ;;  %v1054_v43 = vsub.f32 %v999_v22, %v1038_v41  ;;  %v1055_v44 = vsub.f32 %v1573_v17, %v1038_v41  ;;  %v1053_v45 = vsub.f32 %v1570_v10, %v1038_v41 }
 0x36e   : > { %v1052_v48 = vsub.f32 %v989_v12, %v1038_v41  ;;  %v1051_v50 = vsub.f32 %v1567_v8, %v1038_v41  ;;  %v1050_v52 = vsub.f32 %v979_v9, %v1038_v41  ;;  %v1049_v53 = vsub.f32 %v1564_v6, %v1038_v41 }
 0x36f   : > { %1710 = vpow2.f32 %v1032_v42  ;;  %v1086_v46 = vmul.f32 1.442695, %v1055_v44  ;;  %v1084_v47 = vmul.f32 1.442695, %v1054_v43  ;;  %v1082_v49 = vmul.f32 1.442695, %v1053_v45  ;;  %v678_v45 = vpop.permute.xlu1 %677 }
 0x370   : > { %v1080_v51 = vmul.f32 1.442695, %v1052_v48  ;;  %v1078_v54 = vmul.f32 1.442695, %v1051_v50  ;;  %v1048_v55 = vsub.f32 %v969_v7, %v1038_v41  ;;  %v1041_v56 = vsub.f32 %v2093_v62, %v1038_v41 }
 0x371   : > { %1712 = vpow2.f32 %v1086_v46  ;;  %v1076_v57 = vmul.f32 1.442695, %v1050_v52  ;;  %v1040_v59 = vsub.f32 %v2095_v63, %v1038_v41  ;;  %v1074_v60 = vmul.f32 1.442695, %v1049_v53 }
 0x372   : > { %1714 = vpow2.f32 %v1084_v47  ;;  %v1047_v61 = vsub.f32 %v2105_v4, %v1038_v41  ;;  %v1072_v10 = vmul.f32 1.442695, %v1048_v55  ;;  %v1042_v8 = vsub.f32 %v2099_v1, %v1038_v41 }
 0x373   : > { %1716 = vpow2.f32 %v1082_v49  ;;  %v1046_v11 = vsub.f32 %v2107_v5, %v1038_v41  ;;  %v1058_v9 = vmul.f32 1.442695, %v1041_v56  ;;  %v1043_v7 = vsub.f32 %v2097_v0, %v1038_v41 }
 0x374   : > { %1718 = vpow2.f32 %v1080_v51  ;;  %v1056_v62 = vmul.f32 1.442695, %v1040_v59  ;;  %v1070_v12 = vmul.f32 1.442695, %v1047_v61  ;;  %v1045_v63 = vsub.f32 %v2101_v2, %v1038_v41 }
 0x375   : > { %1720 = vpow2.f32 %v1078_v54  ;;  %v1044_v1 = vsub.f32 %v2103_v3, %v1038_v41  ;;  %v1060_v13 = vmul.f32 1.442695, %v1042_v8  ;;  %v1068_v14 = vmul.f32 1.442695, %v1046_v11  ;;  %v768_v41 = vpop.f32.mrf.mxu1  ;;  %v1114_v8 = vld [vmem:[#allocation5] sm:$0xff]  ;;  %v1113_v11 = vld [vmem:[#allocation5 + $0x10] sm:$0xff] }
 0x376   : > { %1722 = vpow2.f32 %v1076_v57  ;;  %v1062_v0 = vmul.f32 1.442695, %v1043_v7  ;;  %v1066_v2 = vmul.f32 1.442695, %v1045_v63  ;;  %v764_v43 = vadd.f32 %v2091_v58, %v668_v33  ;;  %v1088_v57 = vld [vmem:[#allocation4] sm:$0x1] }
 0x377   : > { %1724 = vpow2.f32 %v1074_v60  ;;  %v1064_v16 = vmul.f32 1.442695, %v1044_v1  ;;  %v769_v46 = vadd.f32 %v768_v41, %v673_v39  ;;  %v774_v48 = vadd.f32 %v1547_v36, %v678_v45 }
 0x378   : > { %1726 = vpow2.f32 %v1072_v10 }
 0x379   : > { %1728 = vpow2.f32 %v1058_v9 }
 0x37a   : > { %1730 = vpow2.f32 %v1056_v62  ;;  %v1116_v62 = vld [vmem:[#allocation5 + $0x8] sm:$0xff] }
 0x37b   : > { %1732 = vpow2.f32 %v1070_v12 }
 0x37c   : > { %v2125_v6 = vpop.eup %1710  ;;  %1734 = vpow2.f32 %v1060_v13  ;;  %v1115_v13 = vld [vmem:[#allocation5 + $0x18] sm:$0xff] }
 0x37d   : > { %v2131_v4 = vrot.slane %v2125_v6, %v2117_v38  ;;  %1736 = vpow2.f32 %v1068_v14  ;;  %v1089_v60 = vmul.f32 %v2125_v6, %v1088_v57 }
 0x37e   : > { %v2134_v5 = vpop.eup %1712  ;;  %1738 = vpow2.f32 %v1062_v0 }
 0x37f   : > { %1574 = vmatprep.subr.mxu1 %v2134_v5  ;;  %v2137_v15 = vpop.eup %1714  ;;  %1740 = vpow2.f32 %v1066_v2  ;;  %v1124_v9 = vmul.f32 %v2131_v4, %v1114_v8  ;;  %v1123_v63 = vmul.f32 %v2131_v4, %v1113_v11  ;;  %v1126_v14 = vmul.f32 %v2131_v4, %v1116_v62 }
 0x380   : > { %1575 = vmatpush3.msra.mxu1 %v2134_v5  ;;  %v2141_v3 = vpop.eup %1716  ;;  %1742 = vpow2.f32 %v1064_v16 }
 0x381   : > { %1576 = vmatprep.subr.mxu1 %v2137_v15  ;;  %v2145_v17 = vpop.eup %1718 }
 0x382   : > { %1577 = vmatpush3.msra.mxu1 %v2137_v15  ;;  %v1721_v18 = vpop.eup %1720 }
 0x383   : > { %1578 = vmatprep.subr.mxu1 %v2141_v3  ;;  %v1723_v19 = vpop.eup %1722 }
 0x384   : > { %1579 = vmatpush3.msra.mxu1 %v2141_v3  ;;  %v1725_v20 = vpop.eup %1724 }
 0x385   : > { %1580 = vmatprep.subr.mxu1 %v2145_v17  ;;  %v1727_v21 = vpop.eup %1726 }
 0x386   : > { %1581 = vmatpush3.msra.mxu1 %v2145_v17  ;;  %v1729_v22 = vpop.eup %1728 }
 0x387   : > { %1582 = vmatprep.subr.mxu1 %v1721_v18  ;;  %v1731_v23 = vpop.eup %1730 }
 0x388   : > { %1583 = vmatpush3.msra.mxu1 %v1721_v18  ;;  %v1733_v24 = vpop.eup %1732  ;;  %v1090_v25 = vadd.f32 %v1731_v23, %v1729_v22 }
 0x389   : > { %1584 = vmatprep.subr.mxu1 %v1723_v19  ;;  %v1735_v26 = vpop.eup %1734 }
 0x38a   : > { %1585 = vmatpush3.msra.mxu1 %v1723_v19  ;;  %v1737_v27 = vpop.eup %1736  ;;  %v1091_v28 = vadd.f32 %v1735_v26, %v1090_v25 }
 0x38b   : > { %1586 = vmatprep.subr.mxu1 %v1725_v20  ;;  %v1739_v29 = vpop.eup %1738 }
 0x38c   : > { %1587 = vmatpush3.msra.mxu1 %v1725_v20  ;;  %v1741_v30 = vpop.eup %1740  ;;  %v1092_v31 = vadd.f32 %v1739_v29, %v1091_v28 }
 0x38d   : > { %1588 = vmatprep.subr.mxu1 %v1727_v21  ;;  %v1743_v32 = vpop.eup %1742 }
 0x38e   : > { %1589 = vmatpush3.msra.mxu1 %v1727_v21  ;;  %v1093_v34 = vadd.f32 %v1743_v32, %v1092_v31 }
 0x38f   : > { %1590 = vmatprep.subr.mxu1 %v1733_v24 }
 0x390   : > { %1591 = vmatpush3.msra.mxu1 %v1733_v24  ;;  %v1094_v35 = vadd.f32 %v1741_v30, %v1093_v34 }
 0x391   : > { %1592 = vmatprep.subr.mxu1 %v1737_v27 }
 0x392   : > { %1593 = vmatpush3.msra.mxu1 %v1737_v27  ;;  %v1095_v37 = vadd.f32 %v1737_v27, %v1094_v35 }
 0x393   : > { %1594 = vmatprep.subr.mxu1 %v1741_v30 }
 0x394   : > { %1595 = vmatpush3.msra.mxu1 %v1741_v30  ;;  %v1096_v40 = vadd.f32 %v1733_v24, %v1095_v37 }
 0x395   : > { %1596 = vmatprep.subr.mxu1 %v1743_v32 }
 0x396   : > { %1597 = vmatpush3.msra.mxu1 %v1743_v32  ;;  %v1097_v42 = vadd.f32 %v1727_v21, %v1096_v40 }
 0x397   : > { %1598 = vmatprep.subr.mxu1 %v1739_v29 }
 0x398   : > { %1599 = vmatpush3.msra.mxu1 %v1739_v29  ;;  %v1098_v44 = vadd.f32 %v1725_v20, %v1097_v42 }
 0x399   : > { %1600 = vmatprep.subr.mxu1 %v1735_v26 }
 0x39a   : > { %1601 = vmatpush3.msra.mxu1 %v1735_v26  ;;  %v1099_v47 = vadd.f32 %v1723_v19, %v1098_v44 }
 0x39b   : > { %1602 = vmatprep.subr.mxu1 %v1729_v22 }
 0x39c   : > { %1603 = vmatpush3.msra.mxu1 %v1729_v22  ;;  %v1100_v49 = vadd.f32 %v1721_v18, %v1099_v47 }
 0x39d   : > { %1604 = vmatprep.subr.mxu1 %v1731_v23 }
 0x39e   : > { %1605 = vmatpush3.msra.mxu1 %v1731_v23  ;;  %v1101_v50 = vadd.f32 %v2145_v17, %v1100_v49 }
 0x39f   : > { %1607 = vmatmul.mubr.f32.vlgmr.msra.gmra.mxu1 %v764_v43 }
 0x3a0   : > { %1609 = vmatprep.mubr.f32.mxu1 %v769_v46  ;;  %v1102_v51 = vadd.f32 %v2141_v3, %v1101_v50 }
 0x3a2   : > { %v1103_v52 = vadd.f32 %v2137_v15, %v1102_v51  ;;  %v1125_v15 = vmul.f32 %v2131_v4, %v1115_v13 }
 0x3a3   : > { %1610 = vmatmul.mubr.f32.gmra.mxu1 %v774_v48 }
 0x3a4   : > { %v1104_v53 = vadd.f32 %v2134_v5, %v1103_v52 }
 0x3a6   : > { %v1105_v58 = vrot.slane %v1104_v53, 4 }
 0x3a8   : > { %v1106_v54 = vadd.f32 %v1105_v58, %v1104_v53 }
 0x3aa   : > { %v1107_v55 = vrot.slane %v1106_v54, 2 }
 0x3ac   : > { %v1108_v56 = vadd.f32 %v1107_v55, %v1106_v54 }
 0x3ae   : > { %v1109_v59 = vrot.slane %v1108_v56, 1 }
 0x3b0   : > { %v1110_v61 = vadd.f32 %v1109_v59, %v1108_v56 }
 0x3b2   : > { %v1111_v10 = vadd.f32 %v1110_v61, %v1089_v60 }
 0x3b4   : > { %1112 = vst [vmem:[#allocation4] sm:$0x1] %v1111_v10 }
 0x45f   : > { %v1608_v7 = vpop.f32.mrf.mxu1 }
 0x460   : > { %v1213_v12 = vadd.f32 %v1608_v7, %v1124_v9 }
 0x461   : > { %v1193_v1 = vpop.f32.mrf.mxu1 }
 0x462   : > { %1217 = vst [vmem:[#allocation5] sm:$0xff] %v1213_v12  ;;  %v1212_v5 = vadd.f32 %v1193_v1, %v1123_v63 }
 0x463   : > { %v1611_v0 = vpop.f32.mrf.mxu1 }
 0x464   : > { %1216 = vst [vmem:[#allocation5 + $0x10] sm:$0xff] %v1212_v5  ;;  %v1215_v6 = vadd.f32 %v1611_v0, %v1126_v14  ;;  %1224 = sbr.rel (%p1451_p3) target bundleno = 1154 (0x482), region = 140 }
 0x465   : > { %v1203_v2 = vpop.f32.mrf.mxu1 }
 0x466   : > { %1219 = vst [vmem:[#allocation5 + $0x8] sm:$0xff] %v1215_v6  ;;  %v1214_v16 = vadd.f32 %v1203_v2, %v1125_v15 }
 0x468   : > { %1218 = vst [vmem:[#allocation5 + $0x18] sm:$0xff] %v1214_v16 }
 0x469   : > { %v1225_v3 = vld [vmem:[#allocation4] sm:$0x1]  ;;  %v1228_v19 = vld [vmem:[#allocation5] sm:$0xff]  ;;  %v1246_v22 = vstv %s1245_s11  ;;  %v1242_v28 = vld [vmem:[%s2019_s23 + $0x8] sm:$0xff] }
 0x46a   : > { %1744 = vrcp.f32 %v1225_v3  ;;  %v1241_v24 = vld [vmem:[%s2019_s23] sm:$0xff]  ;;  %v1243_v29 = vld [vmem:[%s2019_s23 + $0x10] sm:$0xff]  ;;  %v1244_v30 = vld [vmem:[%s2019_s23 + $0x18] sm:$0xff] }
 0x46b   : > { %v1227_v17 = vld [vmem:[#allocation5 + $0x10] sm:$0xff] }
 0x46d   : > { %v1230_v21 = vld [vmem:[#allocation5 + $0x8] sm:$0xff] }
 0x46f   : > { %v1229_v20 = vld [vmem:[#allocation5 + $0x18] sm:$0xff] }
 0x477   : > { %v1745_v18 = vpop.eup %1744 }
 0x478   : > { %v1235_v4 = vrot.slane %v1745_v18, %v2117_v38 }
 0x47a   : > { %v1237_v23 = vmul.f32 %v1235_v4, %v1227_v17  ;;  %v1238_v25 = vmul.f32 %v1235_v4, %v1228_v19  ;;  %v1239_v26 = vmul.f32 %v1235_v4, %v1229_v20  ;;  %v1240_v27 = vmul.f32 %v1235_v4, %v1230_v21 }
 0x47c   : > { %v1247_v31 = vmul.f32 %v1246_v22, %v1237_v23  ;;  %v1248_v32 = vmul.f32 %v1246_v22, %v1238_v25  ;;  %v1249_v33 = vmul.f32 %v1246_v22, %v1239_v26  ;;  %v1250_v34 = vmul.f32 %v1246_v22, %v1240_v27 }
 0x47e   : > { %v1251_v35 = vadd.f32 %v1247_v31, %v1241_v24  ;;  %v1252_v36 = vadd.f32 %v1248_v32, %v1242_v28  ;;  %v1253_v38 = vadd.f32 %v1249_v33, %v1243_v29  ;;  %v1254_v37 = vadd.f32 %v1250_v34, %v1244_v30 }
 0x480   : > { %1255 = vst [vmem:[%s2023_s10] sm:$0xff] %v1251_v35  ;;  %1256 = vst [vmem:[%s2023_s10 + $0x8] sm:$0xff] %v1252_v36 }
 0x481   : > { %1257 = vst [vmem:[%s2023_s10 + $0x10] sm:$0xff] %v1253_v38  ;;  %1258 = vst [vmem:[%s2023_s10 + $0x18] sm:$0xff] %v1254_v37 }
 0x482 PF: > { %1265 = sbr.rel (!%p1985_p9) target bundleno = 1166 (0x48e), region = 144  ;;  %s2239_s13 = sld [smem:[#allocation11_spill]] (%p1985_p9) }
 0x483   : > { %s2240_s27 = sld [smem:[#allocation10_spill]] (%p1985_p9) }
 0x484   : > { %s2241_s28 = sld [smem:[#allocation16_spill]] (%p1985_p9) }
 0x487   : > { %v1304_v39 = vld [vmem:[%s2023_s10] sm:$0xff]  ;;  %v1306_v40 = vld [vmem:[%s2023_s10 + $0x8] sm:$0xff] }
 0x488   : > { %s1453_s23 = sshll.u32 %s2239_s13, 3  ;;  %v1308_v41 = vld [vmem:[%s2023_s10 + $0x10] sm:$0xff]  ;;  %v1310_v42 = vld [vmem:[%s2023_s10 + $0x18] sm:$0xff] }
 0x489   : > { %s1267_s26 = sadd.s32 %s2240_s27, %s1453_s23 }
 0x48a   : > { %s1454_s9 = sshll.u32 %s1267_s26, 3 }
 0x48b   : > { %s1269_s29 = scalar_lea.vmem %s2241_s28, %s1454_s9 }
 0x48c   : > { %1305 = vst [vmem:[%s1269_s29] sm:$0xff] %v1304_v39  ;;  %1307 = vst [vmem:[%s1269_s29 + $0x10] sm:$0xff] %v1306_v40 }
 0x48d   : > { %1309 = vst [vmem:[%s1269_s29 + $0x20] sm:$0xff] %v1308_v41  ;;  %1311 = vst [vmem:[%s1269_s29 + $0x30] sm:$0xff] %v1310_v42 }
 0x48e PF: > { %s20_s8 = sadd.s32 1, %s1832_s8   ;;  %s2242_s10 = sld [smem:[#allocation12_spill]] }
 0x48f   : > { %p17_p4 = scmp.ge.s32.totalorder %s20_s8, 10   ;;  %s2243_s21 = sld [smem:[#allocation13_spill]] }
 0x490   : > { %s2244_s25 = sld [smem:[#allocation14_spill]]  ;;  %s2245_s11 = smov %s1796_s12 }
 0x491   : > { %s2246_s12 = smov %s1996_s22  ;;  %s2247_s13 = smov %s1804_s14 }
 0x492   : > { %s2248_s14 = smov %s1993_s24  ;;  %s2249_s15 = smov %s1820_s18 }
 0x493   : > { %s2250_s16 = smov %s1824_s19  ;;  %s2251_s17 = smov %s1828_s20 }
 0x494   : > { %s2252_s18 = smov %s2242_s10  ;;  %19 = sbr.rel (!%p17_p4) target bundleno = 9 (0x9), region = 221 }
 0x495   : > { %s2253_s19 = smov %s2243_s21 }
 0x496   : > { %s2254_s20 = smov %s2244_s25 }

</bundles_post_ra>
